<compile_context>
chip_gen: v6e
topology: v6e:2x2x1
jax: 0.10.0
libtpu: 0.0.40
codegen_flags: <defaults>
</compile_context>

<pallas_src>
import functools

import jax
import jax.numpy as jnp
from jax.experimental import pallas as pl
from jax.experimental.pallas import tpu as pltpu


def _round_up(x, m):
    return ((x + m - 1) // m) * m


def mlp_kernel(x_ref, w1_ref, b1_ref, w2_ref, b2_ref, o_ref, *, mxu_dtype):
    x = x_ref[...]
    w1 = w1_ref[...]
    w2 = w2_ref[...]
    if mxu_dtype is not None:
        # In-kernel cast only (no extra HBM traffic); accumulation stays f32.
        x, w1, w2 = (t.astype(mxu_dtype) for t in (x, w1, w2))

    # ----- lin1: x @ W1 (MXU, f32 accumulate) + b1 -----
    h = jnp.dot(x, w1, preferred_element_type=jnp.float32) + b1_ref[...]
    # ----- ReLU (f32 on the VPU) -----
    h = jnp.maximum(h, 0.0)
    # ----- dropout: identity in eval mode -----
    # TODO(synk): training-mode dropout would use pltpu.prng_seed /
    #             pltpu.prng_random_bits with 1/(1-p) scaling.
    if mxu_dtype is not None:
        h = h.astype(mxu_dtype)
    # ----- lin2: h @ W2 + b2 -----
    out = jnp.dot(h, w2, preferred_element_type=jnp.float32) + b2_ref[...]
    o_ref[...] = out.astype(o_ref.dtype)


def prepare_params(w1, b1, w2, b2, *, param_dtype=jnp.float32):
    """One-time parameter prep -- call at model load, NOT per forward.

    w1: [nfeat, nhid]  (PyTorch lin1.weight.T)    b1: [nhid]
    w2: [nhid, nclass] (PyTorch lin2.weight.T)    b2: [nclass]
    """
    w1 = jnp.asarray(w1, param_dtype)
    w2 = jnp.asarray(w2, param_dtype)
    b1 = jnp.asarray(b1, jnp.float32).reshape(1, -1)
    b2 = jnp.asarray(b2, jnp.float32).reshape(1, -1)
    return w1, b1, w2, b2


def mlp_forward(x, w1, b1, w2, b2, *, block_b=None, mxu_dtype=None):
    """Fused MLP forward.

    x : [B, nfeat] f32, w1: [nfeat, nhid], b1: [1, nhid],
    w2: [nhid, nclass],  b2: [1, nclass]   ->   [B, nclass] f32
    """
    B, nfeat = x.shape
    nfeat_w, nhid = w1.shape
    assert nfeat_w == nfeat
    nclass = w2.shape[1]

    # Batch tile: multiple of 8 (sublane rule).  Large cap (2048 rows)
    # amortizes the ~0.35us per-step overhead and maximizes DMA size; for
    # large B keep >= 2 grid steps so both v7x TensorCores get work.
    if block_b is None:
        block_b = min(2048, max(8, _round_up(pl.cdiv(B, 2), 8)))
    block_b = max(8, _round_up(block_b, 8))
    grid = (pl.cdiv(B, block_b),)

    # Per-step VMEM: double-buffered x / out tiles + single-buffered resident
    # weights & biases; 2x headroom, small floor, well under v7x's 64 MiB.
    vmem_bytes = (2 * block_b * nfeat * x.dtype.itemsize
                  + 2 * block_b * nclass * 4
                  + w1.size * w1.dtype.itemsize + w2.size * w2.dtype.itemsize
                  + (b1.size + b2.size) * 4)
    vmem_limit = int(min(32 * 1024 * 1024, max(4 * 1024 * 1024, 2 * vmem_bytes)))

    # Honest cost hints from the real (unpadded) dims.
    flops = 2 * B * (nfeat * nhid + nhid * nclass)
    bytes_accessed = (x.size * x.dtype.itemsize
                      + w1.size * w1.dtype.itemsize
                      + w2.size * w2.dtype.itemsize
                      + (b1.size + b2.size) * 4
                      + B * nclass * 4)

    resident = dict(pipeline_mode=pl.Buffered(1))  # constant-index operands

    return pl.pallas_call(
        functools.partial(mlp_kernel, mxu_dtype=mxu_dtype),
        out_shape=jax.ShapeDtypeStruct((B, nclass), jnp.float32),
        grid=grid,
        in_specs=[
            pl.BlockSpec((block_b, nfeat), lambda i: (i, 0)),             # x (streamed)
            pl.BlockSpec((nfeat, nhid),    lambda i: (0, 0), **resident),  # W1 (resident)
            pl.BlockSpec((1, nhid),        lambda i: (0, 0), **resident),  # b1
            pl.BlockSpec((nhid, nclass),   lambda i: (0, 0), **resident),  # W2 (resident)
            pl.BlockSpec((1, nclass),      lambda i: (0, 0), **resident),  # b2
        ],
        out_specs=pl.BlockSpec((block_b, nclass), lambda i: (i, 0)),
        compiler_params=pltpu.CompilerParams(
            dimension_semantics=("parallel",),
            vmem_limit_bytes=vmem_limit),
        cost_estimate=pl.CostEstimate(flops=flops, transcendentals=0,
                                      bytes_accessed=bytes_accessed),
    )(x, w1, b1, w2, b2)


if __name__ == "__main__":
    # Small shapes consistent with MLP(nfeat, nhid, nclass, dropout).
    B, nfeat, nhid, nclass = 8, 32, 64, 16

    key = jax.random.PRNGKey(0)
    kx, kw1, kb1, kw2, kb2 = jax.random.split(key, 5)

    x = jax.random.normal(kx, (B, nfeat), dtype=jnp.float32)
    # Synthetic parameters stored as [in, out] (i.e. PyTorch weight.T).
    w1 = jax.random.normal(kw1, (nfeat, nhid), dtype=jnp.float32) * 0.1
    b1 = jax.random.normal(kb1, (nhid,), dtype=jnp.float32) * 0.1
    w2 = jax.random.normal(kw2, (nhid, nclass), dtype=jnp.float32) * 0.1
    b2 = jax.random.normal(kb2, (nclass,), dtype=jnp.float32) * 0.1

    # Hoisted one-time parameter prep (review: constants off the hot path).
    w1_p, b1_p, w2_p, b2_p = prepare_params(w1, b1, w2, b2)

    # Reference in plain JAX f32 (eval-mode dropout = identity).
    ref = jnp.maximum(x @ w1 + b1, 0.0) @ w2 + b2

    # Test 1: tiny batch, single grid step, f32 end-to-end.
    out = jax.block_until_ready(mlp_forward(x, w1_p, b1_p, w2_p, b2_p))
    assert out.shape == (B, nclass)
    assert jnp.allclose(out, ref, atol=2e-2, rtol=2e-2)

    # Test 2: ragged batch (300 rows) + explicit tile of 128 -> grid of 3
    # steps with a partial last block (44 valid rows), unpadded output.
    B2 = 300
    x2 = jax.random.normal(jax.random.PRNGKey(1), (B2, nfeat), dtype=jnp.float32)
    ref2 = jnp.maximum(x2 @ w1 + b1, 0.0) @ w2 + b2
    out2 = jax.block_until_ready(
        mlp_forward(x2, w1_p, b1_p, w2_p, b2_p, block_b=128))
    assert out2.shape == (B2, nclass)
    assert jnp.allclose(out2, ref2, atol=2e-2, rtol=2e-2)

    # Test 3: default tile (2 grid steps for megacore) + in-kernel bf16 MXU
    # path (zero extra HBM traffic, looser tolerance).
    out3 = jax.block_until_ready(
        mlp_forward(x2, w1_p, b1_p, w2_p, b2_p, mxu_dtype=jnp.bfloat16))
    assert out3.shape == (B2, nclass)
    assert jnp.allclose(out3, ref2, atol=5e-2, rtol=5e-2)

    print("KERNEL_OK")
</pallas_src>

<mosaic_0001>
module attributes {stable_mosaic.version = 11 : i64} {
  func.func @mlp_kernel(%arg0: i32, %arg1: memref<8x32xf32, #tpu.memory_space<vmem>>, %arg2: memref<32x64xf32, #tpu.memory_space<vmem>>, %arg3: memref<1x64xf32, #tpu.memory_space<vmem>>, %arg4: memref<64x16xf32, #tpu.memory_space<vmem>>, %arg5: memref<1x16xf32, #tpu.memory_space<vmem>>, %arg6: memref<8x16xf32, #tpu.memory_space<vmem>>) attributes {dimension_semantics = [#tpu.dimension_semantics<parallel>], iteration_bounds = array<i64: 1>, scalar_prefetch = 0 : i64, scratch_operands = 0 : i64, tpu.core_type = #tpu.core_type<tc>, window_params = [{transform_indices = @transform_0, window_bounds = array<i64: 8, 32>}, {pipeline_mode = #tpu.pipeline_mode<synchronous>, transform_indices = @transform_1, window_bounds = array<i64: 32, 64>}, {pipeline_mode = #tpu.pipeline_mode<synchronous>, transform_indices = @transform_2, window_bounds = array<i64: 1, 64>}, {pipeline_mode = #tpu.pipeline_mode<synchronous>, transform_indices = @transform_3, window_bounds = array<i64: 64, 16>}, {pipeline_mode = #tpu.pipeline_mode<synchronous>, transform_indices = @transform_4, window_bounds = array<i64: 1, 16>}, {transform_indices = @transform_5, window_bounds = array<i64: 8, 16>}]} {
    %c0 = arith.constant 0 : index
    %c0_0 = arith.constant 0 : index
    %0 = vector.load %arg1[%c0, %c0_0] : memref<8x32xf32, #tpu.memory_space<vmem>>, vector<8x32xf32>
    %c0_1 = arith.constant 0 : index
    %c0_2 = arith.constant 0 : index
    %1 = vector.load %arg2[%c0_1, %c0_2] : memref<32x64xf32, #tpu.memory_space<vmem>>, vector<32x64xf32>
    %c0_3 = arith.constant 0 : index
    %c0_4 = arith.constant 0 : index
    %2 = vector.load %arg4[%c0_3, %c0_4] : memref<64x16xf32, #tpu.memory_space<vmem>>, vector<64x16xf32>
    %cst = arith.constant dense<0.000000e+00> : vector<8x64xf32>
    %3 = tpu.matmul %0, %1, %cst {dimension_numbers = #tpu.dot_dimension_numbers<[1], [0], [0], [1], [0, 0, 1, 1], [], []>} : vector<8x32xf32>, vector<32x64xf32>, vector<8x64xf32> -> vector<8x64xf32>
    %c0_5 = arith.constant 0 : index
    %c0_6 = arith.constant 0 : index
    %4 = vector.load %arg3[%c0_5, %c0_6] : memref<1x64xf32, #tpu.memory_space<vmem>>, vector<1x64xf32>
    %5 = vector.broadcast %4 : vector<1x64xf32> to vector<8x64xf32>
    %6 = arith.addf %3, %5 : vector<8x64xf32>
    %cst_7 = arith.constant 0.000000e+00 : f32
    %7 = vector.broadcast %cst_7 : f32 to vector<8x64xf32>
    %8 = arith.maximumf %6, %7 : vector<8x64xf32>
    %cst_8 = arith.constant dense<0.000000e+00> : vector<8x16xf32>
    %9 = tpu.matmul %8, %2, %cst_8 {dimension_numbers = #tpu.dot_dimension_numbers<[1], [0], [0], [1], [0, 0, 1, 1], [], []>} : vector<8x64xf32>, vector<64x16xf32>, vector<8x16xf32> -> vector<8x16xf32>
    %c0_9 = arith.constant 0 : index
    %c0_10 = arith.constant 0 : index
    %10 = vector.load %arg5[%c0_9, %c0_10] : memref<1x16xf32, #tpu.memory_space<vmem>>, vector<1x16xf32>
    %11 = vector.broadcast %10 : vector<1x16xf32> to vector<8x16xf32>
    %12 = arith.addf %9, %11 : vector<8x16xf32>
    %c0_11 = arith.constant 0 : index
    %c0_12 = arith.constant 0 : index
    %13 = vector.load %arg6[%c0_11, %c0_12] : memref<8x16xf32, #tpu.memory_space<vmem>>, vector<8x16xf32>
    tpu.vector_store %arg6[%c0_11, %c0_12], %12 {strides = array<i32>} : memref<8x16xf32, #tpu.memory_space<vmem>>, vector<8x16xf32>,
    return
  }
  func.func @transform_0(%arg0: i32) -> (i32, i32) {
    %c0_i32 = arith.constant 0 : i32
    %c0_i32_0 = arith.constant 0 : i32
    return %arg0, %c0_i32 : i32, i32
  }
  func.func @transform_1(%arg0: i32) -> (i32, i32) {
    %c0_i32 = arith.constant 0 : i32
    %c0_i32_0 = arith.constant 0 : i32
    %c0_i32_1 = arith.constant 0 : i32
    return %c0_i32, %c0_i32_0 : i32, i32
  }
  func.func @transform_2(%arg0: i32) -> (i32, i32) {
    %c0_i32 = arith.constant 0 : i32
    %c0_i32_0 = arith.constant 0 : i32
    %c0_i32_1 = arith.constant 0 : i32
    return %c0_i32, %c0_i32_0 : i32, i32
  }
  func.func @transform_3(%arg0: i32) -> (i32, i32) {
    %c0_i32 = arith.constant 0 : i32
    %c0_i32_0 = arith.constant 0 : i32
    %c0_i32_1 = arith.constant 0 : i32
    return %c0_i32, %c0_i32_0 : i32, i32
  }
  func.func @transform_4(%arg0: i32) -> (i32, i32) {
    %c0_i32 = arith.constant 0 : i32
    %c0_i32_0 = arith.constant 0 : i32
    %c0_i32_1 = arith.constant 0 : i32
    return %c0_i32, %c0_i32_0 : i32, i32
  }
  func.func @transform_5(%arg0: i32) -> (i32, i32) {
    %c0_i32 = arith.constant 0 : i32
    %c0_i32_0 = arith.constant 0 : i32
    return %arg0, %c0_i32 : i32, i32
  }
}

</mosaic_0001>

<bundles_post_ra>
// kernel: tpu_custom_call.1
= control target key start
LH: loop header
LB: loop body
LE: loop exit
PB: predicated region body
PF: predicated region fallthrough
CT: control target
= control target key end

     0   :  { %v286_v1 = vmov 0.0   ;;  %vm287_vm0 = vmmov 0   ;;  %s369_s0 = inlined_call_operand.vmem [shape: f32[8,32], index: 0, kind: input, shape index: {}]   ;;  %s370_s1 = inlined_call_operand.vmem [shape: f32[32,64], index: 1, kind: input, shape index: {}]   ;;  %s371_s2 = inlined_call_operand.vmem [shape: f32[1,64], index: 2, kind: input, shape index: {}]   ;;  %s372_s3 = inlined_call_operand.vmem [shape: f32[64,16], index: 3, kind: input, shape index: {}]   ;;  %s373_s4 = inlined_call_operand.vmem [shape: f32[1,16], index: 4, kind: input, shape index: {}]   ;;  %s374_s5 = inlined_call_operand.hbm [shape: f32[8,16], index: 5, kind: output, shape index: {}]  }
   0x1   :  { %v25_v0 = vld [vmem:[%s370_s1 + $0x18] sm:$0xff]  ;;  %231 = vmatprep.subr.mxu0 %v286_v1  ;;  %v24_v2 = vld [vmem:[%s370_s1 + $0x10] sm:$0xff]  ;;  %239 = vmatprep.mubr.msk.f32.mxu0 %vm287_vm0, %v286_v1  ;;  %v23_v5 = vld [vmem:[%s370_s1 + $0x8] sm:$0xff] }
   0x2   :  { %v33_v3 = vld [vmem:[%s372_s3 + $0x38] sm:$0xff]  ;;  %232 = vmatpush3.msra.mxu0 %v25_v0  ;;  %242 = vmatprep.subr.mxu1 %v286_v1  ;;  %v32_v4 = vld [vmem:[%s372_s3 + $0x30] sm:$0xff] }
   0x3   :  { %233 = vmatprep.subr.mxu0 %v286_v1  ;;  %243 = vmatpush3.msra.mxu1 %v33_v3 }
   0x4   :  { %10 = vsyncpa [#allocation3], 0  ;;  %234 = vmatpush3.msra.mxu0 %v24_v2  ;;  %244 = vmatprep.subr.mxu1 %v286_v1  ;;  %v31_v6 = vld [vmem:[%s372_s3 + $0x28] sm:$0xff]  ;;  %v22_v7 = vld [vmem:[%s370_s1] sm:$0xff]  ;;  %vm41_vm1 = vcmask 261120   ;;  %vm123_vm2 = vcmask 523264  }
   0x5   :  { %235 = vmatprep.subr.mxu0 %v286_v1  ;;  %245 = vmatpush3.msra.mxu1 %v32_v4  ;;  %v21_v8 = vld [vmem:[%s369_s0] sm:$0xff]  ;;  %v29_v10 = vld [vmem:[%s372_s3 + $0x18] sm:$0xff]  ;;  %v28_v11 = vld [vmem:[%s372_s3 + $0x10] sm:$0xff]  ;;  %s288_s21 = smov [#allocation2]   ;;  %vm197_vm3 = vcmask 130048  }
   0x6   :  { %236 = vmatpush3.msra.mxu0 %v23_v5  ;;  %246 = vmatprep.subr.mxu1 %v286_v1  ;;  %v30_v9 = vld [vmem:[%s372_s3 + $0x20] sm:$0xff]  ;;  %v27_v12 = vld [vmem:[%s372_s3 + $0x8] sm:$0xff]  ;;  %s205_s22 = sshll.u32 %s288_s21, 4  ;;  %s206_s22 = int_to_ptr.vmem [resolvable:$true] %s205_s22 }
   0x7   :  { %237 = vmatprep.subr.mxu0 %v286_v1  ;;  %247 = vmatpush3.msra.mxu1 %v31_v6  ;;  %v26_v13 = vld [vmem:[%s372_s3] sm:$0xff]  ;;  %s264_s3 = scalar_lea.vmem %s206_s22, 128  ;;  %p269_p1 = scmp.lt.s32.totalorder %s206_s22, %s206_s22 }
   0x8   :  { %238 = vmatpush3.msra.mxu0 %v22_v7  ;;  %248 = vmatprep.subr.mxu1 %v286_v1  ;;  %v213_v14 = vld [vmem:[%s371_s2] ss:$0 sm:$0xff]  ;;  %p265_p0 = scmp.ne.s32.totalorder %s206_s22, %s264_s3  ;;  %p270_p2 = scmp.lt.s32.totalorder %s264_s3, %s264_s3 }
   0x9   :  { %240 = vmatmul.mubr.msk.f32.vlgmr.msra.gmra.mxu0 %vm41_vm1, %v21_v8  ;;  %249 = vmatpush3.msra.mxu1 %v30_v9  ;;  %v215_v19 = vld [vmem:[%s373_s4] ss:$0 sm:$0xff] }
   0xa   :  { %250 = vmatprep.subr.mxu1 %v286_v1  ;;  %258 = vmatprep.mubr.msk.f32.mxu1 %vm287_vm0, %v286_v1  ;;  %p271_p3 = por %p270_p2, %p269_p1 }
   0xb   :  { %251 = vmatpush3.msra.mxu1 %v29_v10 }
   0xc   :  { %252 = vmatprep.subr.mxu1 %v286_v1  ;;  %p272_p4 = pnand %p271_p3, %p265_p0 }
   0xd   :  { %253 = vmatpush3.msra.mxu1 %v28_v11 }
   0xe   :  { %254 = vmatprep.subr.mxu1 %v286_v1 }
   0xf   :  { %255 = vmatpush3.msra.mxu1 %v27_v12 }
  0x10   :  { %256 = vmatprep.subr.mxu1 %v286_v1 }
  0x11   :  { %257 = vmatpush3.msra.mxu1 %v26_v13 }
  0xc9   :  { %v111_v15 = vpop.f32.mrf.mxu0 }
  0xca   :  { %v112_v16 = vadd.f32 %v213_v14, %v111_v15 }
  0xcb   :  { %v241_v17 = vpop.f32.mrf.mxu0 }
  0xcc   :  { %v115_v18 = vmax.f32 %v112_v16, 0.0 }
  0xce   :  { %259 = vmatmul.mubr.msk.f32.vlgmr.msra.gmra.mxu1 %vm123_vm2, %v115_v18 }
 0x18e   :  { %v193_v20 = vpop.f32.mrf.mxu1 }
 0x18f   :  { %v194_v21 = vadd.f32 %v215_v19, %v193_v20 }
 0x190   :  { %v260_v22 = vpop.f32.mrf.mxu1 }
 0x191   :  { %198 = vst.msk [vmem:[#allocation2] sm:$0xff] %vm197_vm3, %v194_v21 }
 0x192   :  { %275 = shalt.err (!%p272_p4)
}
 0x193   :  { %208 = dma.vmem_to_hbm [thread:$0]  %s206_s22, 128, %s374_s5, [#allocation3]  }
 0x194   :  { %284 = dma.done.wait [#allocation3], 128  }
 0x195   :  { %285 = vsyncadd [#allocation3], 4294967168 }
 0x196   :  { %212 = vsyncpa [#allocation3], 1 }

</bundles_post_ra>
